<compile_context>
chip_gen: v7x
topology: tpu7x:2x2x1
jax: 0.10.0
libtpu: 0.0.40
codegen_flags: <defaults>
</compile_context>

<pallas_src>
import math

import jax
import jax.numpy as jnp
from jax.experimental import pallas as pl
from jax.experimental.pallas import tpu as pltpu


def _bias_kernel(b_ref, x_ref, o_ref):
    # b_ref: (Rblk, 1) or (1, L) VMEM (resident), x_ref/o_ref: matching VMEM
    # row/lane block.  Pure VPU elementwise add with an in-register broadcast.
    o_ref[...] = x_ref[...] + b_ref[...]


def bias_forward(x, bias, *, target_block_bytes=2 * 1024 * 1024, donate_x=False):
    """Forward of the PyTorch Bias module: x + bias[None, :, None, None] (NCHW)."""
    N, C, H, W = x.shape
    assert bias.shape == (C,)
    dt = x.dtype
    itemsize = jnp.dtype(dt).itemsize
    hw = H * W
    rows = N * C
    total_bytes = rows * hw * itemsize

    # Sublane packing by dtype: f32 -> 8, bf16/f16 -> 16, int8/fp8 -> 32.
    sub = {2: 16, 1: 32}.get(itemsize, 8)

    if hw % 128 == 0:
        # ---- Primary lane-dense path: rows = (n, c) pairs, lanes = spatial ----
        # Row block must be a multiple of both the sublane packing and C so the
        # bias pattern within every block is identical -> a single resident tile.
        unit = (sub * C) // math.gcd(sub, C)

        # Lane block: full spatial extent unless it is enormous; always a
        # multiple of 128 so stores stay unmasked (lane-dense).
        max_lanes = max(128, ((target_block_bytes // max(1, unit * itemsize)) // 128) * 128)
        lblk = hw if hw <= max_lanes else max_lanes

        # Row block: ~target_block_bytes of input per block.
        rows_budget = max(1, target_block_bytes // max(1, lblk * itemsize))
        rblk = max(unit, (rows_budget // unit) * unit)

        # Keep each lane-padded (rblk, 1) bias buffer <= ~1 MiB so the total
        # per-step VMEM footprint fits the smallest default scoped limits.
        bias_cap = max(unit, (((1 << 20) // (128 * itemsize)) // unit) * unit)
        rblk = min(rblk, bias_cap)

        # Big problems: deep (>=8 steps) even grid so v7x's 2 TCs both get
        # work and the double-buffer pipeline has something to overlap.
        if total_bytes >= (8 << 20) and rows > unit:
            rblk = min(rblk, max(unit, ((rows // 8) // unit) * unit))
            while rblk > unit and (-(-rows // rblk)) % 2 == 1:
                rblk -= unit

        if rblk >= rows:
            rblk = rows  # full extent (rows = N*C is always a multiple of C)

        x2 = x.reshape(rows, hw)
        bias_tile = jnp.tile(bias.astype(dt), rblk // C).reshape(rblk, 1)

        grid = (pl.cdiv(rows, rblk), pl.cdiv(hw, lblk))
        in_specs = [
            pl.BlockSpec((rblk, 1), lambda i, j: (0, 0)),     # resident bias tile
            pl.BlockSpec((rblk, lblk), lambda i, j: (i, j)),  # x row/lane block
        ]
        out_specs = pl.BlockSpec((rblk, lblk), lambda i, j: (i, j))
        dim_sem = ("parallel", "parallel")
        out2_shape = (rows, hw)
    else:
        # ---- Fallback path (H*W not a multiple of 128): (N, C*H*W) view ----
        # Lane width becomes C*H*W (as wide as possible), bias is a single
        # resident pre-broadcast row.
        L = C * hw
        x2 = x.reshape(N, L)
        rblk = max(1, target_block_bytes // max(1, L * itemsize))
        if rblk < N:
            rblk = max(sub, (rblk // sub) * sub)
        rblk = min(rblk, N)

        bias_tile = jnp.repeat(bias.astype(dt), hw).reshape(1, L)

        grid = (pl.cdiv(N, rblk),)
        in_specs = [
            pl.BlockSpec((1, L), lambda i: (0, 0)),   # resident bias row
            pl.BlockSpec((rblk, L), lambda i: (i, 0)),
        ]
        out_specs = pl.BlockSpec((rblk, L), lambda i: (i, 0))
        dim_sem = ("parallel",)
        out2_shape = (N, L)

    out2 = pl.pallas_call(
        _bias_kernel,
        out_shape=jax.ShapeDtypeStruct(out2_shape, dt),
        grid_spec=pltpu.PrefetchScalarGridSpec(
            num_scalar_prefetch=0,
            grid=grid,
            in_specs=in_specs,
            out_specs=out_specs,
        ),
        compiler_params=pltpu.CompilerParams(
            dimension_semantics=dim_sem,
            # >= every generation's default scoped limit, within every
            # generation's physical VMEM (incl. v7x's 64 MiB).
            vmem_limit_bytes=32 * 1024 * 1024,
        ),
        cost_estimate=pl.CostEstimate(
            flops=rows * hw,
            transcendentals=0,
            bytes_accessed=2 * total_bytes + C * itemsize,
        ),
        # Alias x -> out only when the caller can actually donate x; otherwise
        # XLA would insert a defensive copy and make things worse.
        input_output_aliases=({1: 0} if donate_x else {}),
    )(bias_tile, x2)

    return out2.reshape(N, C, H, W)


if __name__ == "__main__":
    # Small shapes consistent with the module: batch=2, channels=4, spatial=16.
    key = jax.random.PRNGKey(0)
    kx, kb = jax.random.split(key)
    N, C, H, W = 2, 4, 16, 16
    x = jax.random.normal(kx, (N, C, H, W), dtype=jnp.float32)
    # Module inits bias to zeros; use a deterministic nonzero bias so the
    # broadcast path is actually exercised.
    bias = jax.random.normal(kb, (C,), dtype=jnp.float32) * 0.5

    out = jax.block_until_ready(bias_forward(x, bias))
    ref = x + bias[None, :, None, None]
    assert out.shape == (N, C, H, W)
    assert jnp.allclose(out, ref, atol=1e-6), "mismatch vs reference"

    # Also exercise the robustness fallback (H*W not a multiple of 128).
    x7 = jax.random.normal(kx, (N, C, 7, 7), dtype=jnp.float32)
    out7 = jax.block_until_ready(bias_forward(x7, bias))
    ref7 = x7 + bias[None, :, None, None]
    assert jnp.allclose(out7, ref7, atol=1e-6), "mismatch vs reference (7x7)"

    print("KERNEL_OK")
</pallas_src>

<mosaic_0001>
module attributes {stable_mosaic.version = 11 : i64} {
  func.func @_bias_kernel(%arg0: i32, %arg1: i32, %arg2: memref<8x1xf32, #tpu.memory_space<vmem>>, %arg3: memref<8x256xf32, #tpu.memory_space<vmem>>, %arg4: memref<8x256xf32, #tpu.memory_space<vmem>>) attributes {dimension_semantics = [#tpu.dimension_semantics<parallel>, #tpu.dimension_semantics<parallel>], iteration_bounds = array<i64: 1, 1>, scalar_prefetch = 0 : i64, scratch_operands = 0 : i64, tpu.core_type = #tpu.core_type<tc>, window_params = [{pipeline_mode = #tpu.pipeline_mode<synchronous>, transform_indices = @transform_0, window_bounds = array<i64: 8, 1>}, {transform_indices = @transform_1, window_bounds = array<i64: 8, 256>}, {transform_indices = @transform_2, window_bounds = array<i64: 8, 256>}]} {
    %c0 = arith.constant 0 : index
    %c0_0 = arith.constant 0 : index
    %0 = vector.load %arg3[%c0, %c0_0] : memref<8x256xf32, #tpu.memory_space<vmem>>, vector<8x256xf32>
    %c0_1 = arith.constant 0 : index
    %c0_2 = arith.constant 0 : index
    %1 = vector.load %arg2[%c0_1, %c0_2] : memref<8x1xf32, #tpu.memory_space<vmem>>, vector<8x1xf32>
    %2 = vector.broadcast %1 : vector<8x1xf32> to vector<8x256xf32>
    %3 = arith.addf %0, %2 : vector<8x256xf32>
    %c0_3 = arith.constant 0 : index
    %c0_4 = arith.constant 0 : index
    %4 = vector.load %arg4[%c0_3, %c0_4] : memref<8x256xf32, #tpu.memory_space<vmem>>, vector<8x256xf32>
    tpu.vector_store %arg4[%c0_3, %c0_4], %3 {strides = array<i32>} : memref<8x256xf32, #tpu.memory_space<vmem>>, vector<8x256xf32>,
    return
  }
  func.func @transform_0(%arg0: i32, %arg1: i32) -> (i32, i32) {
    %c0_i32 = arith.constant 0 : i32
    %c0_i32_0 = arith.constant 0 : i32
    %c0_i32_1 = arith.constant 0 : i32
    return %c0_i32, %c0_i32_0 : i32, i32
  }
  func.func @transform_1(%arg0: i32, %arg1: i32) -> (i32, i32) {
    %c0_i32 = arith.constant 0 : i32
    return %arg0, %arg1 : i32, i32
  }
  func.func @transform_2(%arg0: i32, %arg1: i32) -> (i32, i32) {
    %c0_i32 = arith.constant 0 : i32
    return %arg0, %arg1 : i32, i32
  }
}

</mosaic_0001>

<bundles_post_ra>
// kernel: tpu_custom_call.1
= control target key start
LH: loop header
LB: loop body
LE: loop exit
PB: predicated region body
PF: predicated region fallthrough
CT: control target
= control target key end

     0   :  { %7 = vsyncpa [#allocation3], 0  ;;  %s148_s0 = inlined_call_operand.vmem [shape: f32[8,1], index: 0, kind: input, shape index: {}]   ;;  %s149_s1 = inlined_call_operand.hbm [shape: f32[8,256], index: 1, kind: input, shape index: {}]   ;;  %s150_s2 = inlined_call_operand.hbm [shape: f32[8,256], index: 2, kind: output, shape index: {}]  }
   0x1   :  { %8 = vsyncpa [#allocation4], 0  ;;  %s103_s9 = smov [#allocation2]   ;;  %s55_s13 = scalar_lea.hbm %s149_s1, 256 }
   0x2   :  { %s17_s10 = sshll.u32 %s103_s9, 4  ;;  %p56_p0 = scmp.ne.s32.totalorder %s149_s1, %s55_s13  ;;  %s18_s10 = int_to_ptr.vmem [resolvable:$true] %s17_s10 }
   0x3   :  { %p59_p1 = scmp.lt.u32.totalorder %s55_s13, %s149_s1 }
   0x5   :  { %p61_p2 = pnand %p59_p1, %p56_p0 }
   0x7   :  { %64 = shalt.err (!%p61_p2)
}
   0x8   :  { %s65_s18 = scalar_lea.vmem %s18_s10, 256  ;;  %p70_p4 = scmp.lt.s32.totalorder %s18_s10, %s18_s10 }
   0x9   :  { %p66_p3 = scmp.ne.s32.totalorder %s18_s10, %s65_s18  ;;  %p71_p5 = scmp.lt.s32.totalorder %s65_s18, %s65_s18 }
   0xb   :  { %p72_p6 = por %p71_p5, %p70_p4 }
   0xd   :  { %p73_p7 = pnand %p72_p6, %p66_p3 }
   0xf   :  { %76 = shalt.err (!%p73_p7)
}
  0x10   :  { %20 = dma.hbm_to_vmem [thread:$0]  %s149_s1, 256, %s18_s10, [#allocation3]  }
  0x11   :  { %99 = dma.done.wait [#allocation3], 256  }
  0x12   :  { %100 = vsyncadd [#allocation3], 4294967040  ;;  %v104_v0 = vmov 0   ;;  %v26_v1 = vld [vmem:[%s148_s0] sm:$0xff]  ;;  %v25_v3 = vld [vmem:[#allocation2 + $0x8] sm:$0xff]  ;;  %s105_s23 = smov [#allocation5]  }
  0x13   :  { %54 = vset.pattern.permute.xlu0 %v104_v0  ;;  %v24_v2 = vld [vmem:[#allocation2] sm:$0xff]  ;;  %s42_s24 = sshll.u32 %s105_s23, 4  ;;  %s43_s24 = int_to_ptr.vmem [resolvable:$true] %s42_s24 }
  0x14   :  { %29 = vperm.xlu0 %54, %v26_v1   ;;  %s77_s1 = scalar_lea.vmem %s43_s24, 256  ;;  %p82_p9 = scmp.lt.s32.totalorder %s43_s24, %s43_s24 }
  0x15   :  { %p78_p8 = scmp.ne.s32.totalorder %s43_s24, %s77_s1  ;;  %p83_p10 = scmp.lt.s32.totalorder %s77_s1, %s77_s1 }
  0x17   :  { %p84_p11 = por %p83_p10, %p82_p9 }
  0x19   :  { %p85_p12 = pnand %p84_p11, %p78_p8 }
  0x93   :  { %v30_v4 = vpop.permute.xlu0 %29 }
  0x94   :  { %v32_v5 = vadd.f32 %v30_v4, %v24_v2  ;;  %v33_v6 = vadd.f32 %v30_v4, %v25_v3 }
  0x96   :  { %34 = vst [vmem:[#allocation5] sm:$0xff] %v32_v5  ;;  %35 = vst [vmem:[#allocation5 + $0x8] sm:$0xff] %v33_v6 }
  0x97   :  { %88 = shalt.err (!%p85_p12)
}
  0x98   :  { %s89_s26 = scalar_lea.hbm %s150_s2, 256 }
  0x99   :  { %p90_p13 = scmp.ne.s32.totalorder %s150_s2, %s89_s26  ;;  %p93_p0 = scmp.lt.u32.totalorder %s89_s26, %s150_s2 }
  0x9b   :  { %p95_p1 = pnand %p93_p0, %p90_p13 }
  0x9d   :  { %98 = shalt.err (!%p95_p1)
}
  0x9e   :  { %45 = dma.vmem_to_hbm [thread:$0]  %s43_s24, 256, %s150_s2, [#allocation4]  }
  0x9f   :  { %101 = dma.done.wait [#allocation4], 256  }
  0xa0   :  { %102 = vsyncadd [#allocation4], 4294967040 }
  0xa1   :  { %49 = vsyncpa [#allocation3], 1 }
  0xa2   :  { %50 = vsyncpa [#allocation4], 1 }

</bundles_post_ra>
